<compile_context>
chip_gen: v7x
topology: tpu7x:2x2x1
jax: 0.10.0
libtpu: 0.0.40
codegen_flags: <defaults>
</compile_context>

<pallas_src>
import functools

import jax
import jax.numpy as jnp
from jax.experimental import pallas as pl
from jax.experimental.pallas import tpu as pltpu


def _round_up(v, m):
    return ((v + m - 1) // m) * m


def _gat_edge_kernel(comb_ref, dstT_ref, nodes_ref, hexp_ref, bias_ref,
                     out_ref, *, hfp, neg_slope):
    """One edge tile: combined gather -> softmax numerator -> fused scatter."""
    t = pl.program_id(0)

    @pl.when(t == 0)
    def _init():
        out_ref[...] = jnp.zeros_like(out_ref)

    # Single combined gather on the MXU:
    #   [src_oh | dst_oh] (TE, 2N) @ nodes (2N, HFp+256)
    #     lanes [0:HFp)        -> Wh[src]
    #     lanes [HFp:HFp+128)  -> esrc[src] + edst[dst]   (heads in lanes 0..H-1)
    #     lanes [HFp+128:)     -> per-dst softmax shift   (heads in lanes 0..H-1)
    g = jnp.dot(comb_ref[...], nodes_ref[...],
                preferred_element_type=jnp.float32)            # (TE, HFp+256)
    wh_src = g[:, :hfp]
    e_blk = g[:, hfp:hfp + 128]
    shift_blk = g[:, hfp + 128:]

    e_blk = jnp.where(e_blk > 0, e_blk, neg_slope * e_blk)     # LeakyReLU
    num = jnp.exp(e_blk - shift_blk)         # f32; lanes >= H hold exp(0)=1 (ignored below)
    num_b = num.astype(jnp.bfloat16)

    # Broadcast each head's numerator across its F feature lanes
    # (head-expansion rows >= H are zero, so garbage lanes are masked out).
    num_full = jnp.dot(num_b, hexp_ref[...],
                       preferred_element_type=jnp.float32)     # (TE, HFp)
    msg = (num_full * wh_src).astype(jnp.bfloat16)             # (TE, HFp)

    # Fused scatter: message features AND softmax denominators in ONE matmul.
    msg_aug = jnp.concatenate([msg, num_b], axis=1)            # (TE, HFp+128)
    out_ref[...] += jnp.dot(dstT_ref[...], msg_aug,
                            preferred_element_type=jnp.float32)  # (N, HFp+128)

    @pl.when(t == pl.num_programs(0) - 1)
    def _finalize():
        acc = out_ref[...]                                     # (N, HFp+128)
        feat = acc[:, :hfp]
        den_blk = acc[:, hfp:]                                 # heads in lanes 0..H-1
        den_full = jnp.dot(den_blk.astype(jnp.bfloat16), hexp_ref[...],
                           preferred_element_type=jnp.float32)  # (N, HFp)
        inv = pl.reciprocal(den_full, approx=True)              # EUP slot
        # Guard isolated destination nodes (den == 0) and padded lanes.
        h_prime = jnp.where(den_full > 0, feat * inv, 0.0) + bias_ref[...]
        out_ref[:, :hfp] = h_prime
        # TODO(synk): nn.Dropout on attention weights is eval-mode identity.


def gat_layer_edge_list(x, edge_index, W, a, bias, *, n_heads, out_features,
                        alpha=0.2, edge_tile=256):
    N, _ = x.shape
    H, F = n_heads, out_features
    HF = H * F
    assert H <= 128, "head count must fit one lane block"
    HFp = _round_up(HF, 128)                 # lane-dense feature width
    E = edge_index.shape[1]

    # Edge tile: multiple of 128 so the transposed dst one-hot tile is
    # lane-aligned and bf16 sublanes pack cleanly.
    TE = _round_up(max(1, min(edge_tile, E)), 128)
    E_pad = _round_up(E, TE)
    n_tiles = E_pad // TE

    src, dst = edge_index[0], edge_index[1]

    # ---- Hoisted node-level work (plain XLA; no longer inside the kernel) ----
    Wh = x.astype(jnp.float32) @ W.astype(jnp.float32)                # (N, HF)
    Wh3 = Wh.reshape(N, H, F)
    a_src = a[:, :F].astype(jnp.float32)
    a_dst = a[:, F:].astype(jnp.float32)
    esrc = jnp.sum(Wh3 * a_src[None], axis=-1)                        # (N, H)
    edst = jnp.sum(Wh3 * a_dst[None], axis=-1)                        # (N, H)

    # Exact per-destination softmax shift (matches the reference segment_max).
    e_edges = esrc[src] + edst[dst]                                   # (E, H)
    e_edges = jnp.where(e_edges > 0, e_edges, alpha * e_edges)
    seg_max = jax.ops.segment_max(e_edges, dst, num_segments=N)       # (N, H)
    # Isolated dst nodes give -inf; replace with 0 (never gathered, and avoids
    # 0 * inf = NaN inside the gather matmul).
    shift = jnp.where(jnp.isfinite(seg_max), seg_max, 0.0)

    # Resident gather matrix (2N, HFp+256): top N rows = source-node payload,
    # bottom N rows = destination-node payload.  bf16 (one-hots are exact).
    GW = HFp + 256
    nodes = jnp.zeros((2 * N, GW), jnp.float32)
    nodes = nodes.at[:N, :HF].set(Wh)
    nodes = nodes.at[:N, HFp:HFp + H].set(esrc)
    nodes = nodes.at[N:, HFp:HFp + H].set(edst)
    nodes = nodes.at[N:, HFp + 128:HFp + 128 + H].set(shift)
    nodes = nodes.astype(jnp.bfloat16)

    # Head-expansion matrix (128, HFp): row h has ones on lanes [h*F, (h+1)*F).
    hexp = jnp.zeros((128, HFp), jnp.float32)
    hexp = hexp.at[:H, :HF].set(jnp.kron(jnp.eye(H, dtype=jnp.float32),
                                         jnp.ones((1, F), jnp.float32)))
    hexp = hexp.astype(jnp.bfloat16)

    bias_pad = jnp.zeros((1, HFp), jnp.float32).at[0, :HF].set(
        bias.astype(jnp.float32))

    # One-hot edge operands.  Padded edges use the out-of-range index N, which
    # jax.nn.one_hot maps to an all-zero row, so they contribute nothing to
    # either the gather or the scatter.
    pad_e = E_pad - E
    if pad_e:
        fill = jnp.full((pad_e,), N, dtype=src.dtype)
        src_p = jnp.concatenate([src, fill])
        dst_p = jnp.concatenate([dst, fill])
    else:
        src_p, dst_p = src, dst
    src_oh = jax.nn.one_hot(src_p, N, dtype=jnp.bfloat16)             # (E_pad, N)
    dst_oh = jax.nn.one_hot(dst_p, N, dtype=jnp.bfloat16)             # (E_pad, N)
    comb_oh = jnp.concatenate([src_oh, dst_oh], axis=1)               # (E_pad, 2N)
    dst_oh_t = dst_oh.T                                               # (N, E_pad) -> MXU-native scatter

    # VMEM budget: real buffers (x2 for double buffering) capped at 75% of
    # physical per-core VMEM (~48 MiB on v7x, ~96 MiB on v5e/v6e).
    est = 2 * (TE * 2 * N * 2 + N * TE * 2 + 2 * N * GW * 2
               + 128 * HFp * 2 + HFp * 4 + N * (HFp + 128) * 4)
    try:
        cap = int(pltpu.get_tpu_info().vmem_capacity_bytes * 3 // 4)
    except Exception:
        cap = 48 * 1024 * 1024
    vmem_limit = min(max(2 * est, 32 * 1024 * 1024), cap)

    kern = functools.partial(_gat_edge_kernel, hfp=HFp, neg_slope=float(alpha))

    grid_spec = pltpu.PrefetchScalarGridSpec(
        num_scalar_prefetch=0,
        grid=(n_tiles,),
        in_specs=[
            pl.BlockSpec((TE, 2 * N), lambda t: (t, 0)),     # [src|dst] one-hot tile
            pl.BlockSpec((N, TE), lambda t: (0, t)),         # dst one-hot, pre-transposed
            pl.BlockSpec((2 * N, GW), lambda t: (0, 0)),     # node payload (resident)
            pl.BlockSpec((128, HFp), lambda t: (0, 0)),      # head expansion
            pl.BlockSpec((1, HFp), lambda t: (0, 0)),        # bias (padded)
        ],
        out_specs=pl.BlockSpec((N, HFp + 128), lambda t: (0, 0)),
    )

    out_full = pl.pallas_call(
        kern,
        out_shape=jax.ShapeDtypeStruct((N, HFp + 128), jnp.float32),
        grid_spec=grid_spec,
        compiler_params=pltpu.CompilerParams(
            dimension_semantics=("arbitrary",),   # edge tiles reduce into resident out
            vmem_limit_bytes=vmem_limit),
    )(comb_oh, dst_oh_t, nodes, hexp, bias_pad)

    # Head-mean + slice in the wrapper (kernel store stays lane-dense).
    return out_full[:, :HF].reshape(N, H, F).mean(axis=1)


def gat_reference(x, edge_index, W, a, bias, *, n_heads, out_features,
                  alpha=0.2):
    """Pure-JAX reference mirroring the PyTorch forward (dropout in eval mode)."""
    N = x.shape[0]
    H, F = n_heads, out_features
    src, dst = edge_index[0], edge_index[1]
    Wh = (x @ W).reshape(N, H, F)
    Wh_src, Wh_dst = Wh[src], Wh[dst]
    a_in = jnp.concatenate([Wh_src, Wh_dst], axis=-1)               # (E, H, 2F)
    e = jnp.sum(a_in * a[None], axis=-1)                            # (E, H)
    e = jnp.where(e > 0, e, alpha * e)
    seg_max = jax.ops.segment_max(e, dst, num_segments=N)           # (N, H)
    num = jnp.exp(e - seg_max[dst])
    den = jax.ops.segment_sum(num, dst, num_segments=N)
    att = num / den[dst]
    msgs = (att[..., None] * Wh_src).reshape(-1, H * F)
    h_prime = jax.ops.segment_sum(msgs, dst, num_segments=N) + bias
    return h_prime.reshape(N, H, F).mean(axis=1)


if __name__ == "__main__":
    key = jax.random.PRNGKey(0)
    N, E = 16, 300
    in_features, out_features, n_heads = 8, 8, 2
    alpha = 0.2

    k1, k2, k3, k4, k5 = jax.random.split(key, 5)
    x = jax.random.normal(k1, (N, in_features), dtype=jnp.float32)
    src = jax.random.randint(k2, (E,), 0, N)
    dst = jax.random.randint(k3, (E,), 0, N)
    edge_index = jnp.stack([src, dst], axis=0)                      # (2, E)

    def xavier_uniform(k, shape):
        fan_out, fan_in = shape[0], shape[1]
        bound = (6.0 / (fan_in + fan_out)) ** 0.5
        return jax.random.uniform(k, shape, jnp.float32, -bound, bound)

    W = xavier_uniform(k4, (in_features, n_heads * out_features))
    a = xavier_uniform(k5, (n_heads, 2 * out_features))
    bias = jnp.zeros((n_heads * out_features,), jnp.float32)

    # edge_tile=128 -> 3 edge tiles over E_pad=384, exercising the resident
    # accumulator / multi-tile reduction path.
    out = gat_layer_edge_list(x, edge_index, W, a, bias,
                              n_heads=n_heads, out_features=out_features,
                              alpha=alpha, edge_tile=128)
    out = jax.block_until_ready(out)

    ref = gat_reference(x, edge_index, W, a, bias,
                        n_heads=n_heads, out_features=out_features,
                        alpha=alpha)
    assert out.shape == (N, out_features)
    # bf16 MXU operands -> relaxed tolerance vs f32 reference.
    assert jnp.allclose(out, ref, atol=5e-2, rtol=5e-2), (
        float(jnp.max(jnp.abs(out - ref))))
    print("KERNEL_OK")
</pallas_src>

<mosaic_0001>
module attributes {stable_mosaic.version = 11 : i64} {
  func.func @_gat_edge_kernel(%arg0: i32, %arg1: memref<128x32xbf16, #tpu.memory_space<vmem>>, %arg2: memref<16x128xbf16, #tpu.memory_space<vmem>>, %arg3: memref<32x384xbf16, #tpu.memory_space<vmem>>, %arg4: memref<128x128xbf16, #tpu.memory_space<vmem>>, %arg5: memref<1x128xf32, #tpu.memory_space<vmem>>, %arg6: memref<16x256xf32, #tpu.memory_space<vmem>>) attributes {dimension_semantics = [#tpu.dimension_semantics<arbitrary>], iteration_bounds = array<i64: 3>, scalar_prefetch = 0 : i64, scratch_operands = 0 : i64, tpu.core_type = #tpu.core_type<tc>, window_params = [{transform_indices = @transform_0, window_bounds = array<i64: 128, 32>}, {transform_indices = @transform_1, window_bounds = array<i64: 16, 128>}, {pipeline_mode = #tpu.pipeline_mode<synchronous>, transform_indices = @transform_2, window_bounds = array<i64: 32, 384>}, {pipeline_mode = #tpu.pipeline_mode<synchronous>, transform_indices = @transform_3, window_bounds = array<i64: 128, 128>}, {pipeline_mode = #tpu.pipeline_mode<synchronous>, transform_indices = @transform_4, window_bounds = array<i64: 1, 128>}, {pipeline_mode = #tpu.pipeline_mode<synchronous>, transform_indices = @transform_5, window_bounds = array<i64: 16, 256>}]} {
    %c0_i32 = arith.constant 0 : i32
    %0 = arith.cmpi eq, %arg0, %c0_i32 : i32
    %1 = arith.extui %0 : i1 to i32
    %c0_i32_0 = arith.constant 0 : i32
    %2 = arith.cmpi ne, %1, %c0_i32_0 : i32
    scf.if %2 {
      %cst_17 = arith.constant 0.000000e+00 : f32
      %30 = vector.broadcast %cst_17 : f32 to vector<16x256xf32>
      %c0_18 = arith.constant 0 : index
      %c0_19 = arith.constant 0 : index
      %31 = vector.load %arg6[%c0_18, %c0_19] : memref<16x256xf32, #tpu.memory_space<vmem>>, vector<16x256xf32>
      tpu.vector_store %arg6[%c0_18, %c0_19], %30 {strides = array<i32>} : memref<16x256xf32, #tpu.memory_space<vmem>>, vector<16x256xf32>,
    } else {
    }
    %c0 = arith.constant 0 : index
    %c0_1 = arith.constant 0 : index
    %3 = vector.load %arg1[%c0, %c0_1] : memref<128x32xbf16, #tpu.memory_space<vmem>>, vector<128x32xbf16>
    %c0_2 = arith.constant 0 : index
    %c0_3 = arith.constant 0 : index
    %4 = vector.load %arg3[%c0_2, %c0_3] : memref<32x384xbf16, #tpu.memory_space<vmem>>, vector<32x384xbf16>
    %cst = arith.constant dense<0.000000e+00> : vector<128x384xf32>
    %5 = tpu.matmul %3, %4, %cst {dimension_numbers = #tpu.dot_dimension_numbers<[1], [0], [0], [1], [0, 0, 1, 1], [], []>} : vector<128x32xbf16>, vector<32x384xbf16>, vector<128x384xf32> -> vector<128x384xf32>
    %6 = vector.extract_strided_slice %5 {offsets = [0, 0], sizes = [128, 128], strides = [1, 1]} : vector<128x384xf32> to vector<128x128xf32>
    %7 = vector.extract_strided_slice %5 {offsets = [0, 128], sizes = [128, 128], strides = [1, 1]} : vector<128x384xf32> to vector<128x128xf32>
    %8 = vector.extract_strided_slice %5 {offsets = [0, 256], sizes = [128, 128], strides = [1, 1]} : vector<128x384xf32> to vector<128x128xf32>
    %cst_4 = arith.constant 0.000000e+00 : f32
    %9 = vector.broadcast %cst_4 : f32 to vector<128x128xf32>
    %10 = arith.cmpf ogt, %7, %9 : vector<128x128xf32>
    %cst_5 = arith.constant 2.000000e-01 : f32
    %11 = vector.broadcast %cst_5 : f32 to vector<128x128xf32>
    %12 = arith.mulf %11, %7 : vector<128x128xf32>
    %13 = arith.select %10, %7, %12 : vector<128x128xi1>, vector<128x128xf32>
    %14 = arith.subf %13, %8 : vector<128x128xf32>
    %15 = math.exp %14 : vector<128x128xf32>
    %16 = arith.truncf %15 : vector<128x128xf32> to vector<128x128xbf16>
    %c0_6 = arith.constant 0 : index
    %c0_7 = arith.constant 0 : index
    %17 = vector.load %arg4[%c0_6, %c0_7] : memref<128x128xbf16, #tpu.memory_space<vmem>>, vector<128x128xbf16>
    %cst_8 = arith.constant dense<0.000000e+00> : vector<128x128xf32>
    %18 = tpu.matmul %16, %17, %cst_8 {dimension_numbers = #tpu.dot_dimension_numbers<[1], [0], [0], [1], [0, 0, 1, 1], [], []>} : vector<128x128xbf16>, vector<128x128xbf16>, vector<128x128xf32> -> vector<128x128xf32>
    %19 = arith.mulf %18, %6 : vector<128x128xf32>
    %20 = arith.truncf %19 : vector<128x128xf32> to vector<128x128xbf16>
    %21 = tpu.concatenate %20, %16 in 1 : vector<128x128xbf16>, vector<128x128xbf16> -> vector<128x256xbf16>
    %c0_9 = arith.constant 0 : index
    %c0_10 = arith.constant 0 : index
    %22 = vector.load %arg6[%c0_9, %c0_10] : memref<16x256xf32, #tpu.memory_space<vmem>>, vector<16x256xf32>
    %c0_11 = arith.constant 0 : index
    %c0_12 = arith.constant 0 : index
    %23 = vector.load %arg2[%c0_11, %c0_12] : memref<16x128xbf16, #tpu.memory_space<vmem>>, vector<16x128xbf16>
    %cst_13 = arith.constant dense<0.000000e+00> : vector<16x256xf32>
    %24 = tpu.matmul %23, %21, %cst_13 {dimension_numbers = #tpu.dot_dimension_numbers<[1], [0], [0], [1], [0, 0, 1, 1], [], []>} : vector<16x128xbf16>, vector<128x256xbf16>, vector<16x256xf32> -> vector<16x256xf32>
    %25 = arith.addf %22, %24 : vector<16x256xf32>
    %c0_14 = arith.constant 0 : index
    %c0_15 = arith.constant 0 : index
    %26 = vector.load %arg6[%c0_14, %c0_15] : memref<16x256xf32, #tpu.memory_space<vmem>>, vector<16x256xf32>
    tpu.vector_store %arg6[%c0_14, %c0_15], %25 {strides = array<i32>} : memref<16x256xf32, #tpu.memory_space<vmem>>, vector<16x256xf32>,
    %c2_i32 = arith.constant 2 : i32
    %27 = arith.cmpi eq, %arg0, %c2_i32 : i32
    %28 = arith.extui %27 : i1 to i32
    %c0_i32_16 = arith.constant 0 : i32
    %29 = arith.cmpi ne, %28, %c0_i32_16 : i32
    scf.if %29 {
      %c0_17 = arith.constant 0 : index
      %c0_18 = arith.constant 0 : index
      %30 = vector.load %arg6[%c0_17, %c0_18] : memref<16x256xf32, #tpu.memory_space<vmem>>, vector<16x256xf32>
      %31 = vector.extract_strided_slice %30 {offsets = [0, 0], sizes = [16, 128], strides = [1, 1]} : vector<16x256xf32> to vector<16x128xf32>
      %32 = vector.extract_strided_slice %30 {offsets = [0, 128], sizes = [16, 128], strides = [1, 1]} : vector<16x256xf32> to vector<16x128xf32>
      %33 = arith.truncf %32 : vector<16x128xf32> to vector<16x128xbf16>
      %c0_19 = arith.constant 0 : index
      %c0_20 = arith.constant 0 : index
      %34 = vector.load %arg4[%c0_19, %c0_20] : memref<128x128xbf16, #tpu.memory_space<vmem>>, vector<128x128xbf16>
      %cst_21 = arith.constant dense<0.000000e+00> : vector<16x128xf32>
      %35 = tpu.matmul %33, %34, %cst_21 {dimension_numbers = #tpu.dot_dimension_numbers<[1], [0], [0], [1], [0, 0, 1, 1], [], []>} : vector<16x128xbf16>, vector<128x128xbf16>, vector<16x128xf32> -> vector<16x128xf32>
      %36 = tpu.reciprocal %35 {approx = true} : vector<16x128xf32> -> vector<16x128xf32>
      %cst_22 = arith.constant 0.000000e+00 : f32
      %37 = vector.broadcast %cst_22 : f32 to vector<16x128xf32>
      %38 = arith.cmpf ogt, %35, %37 : vector<16x128xf32>
      %39 = arith.mulf %31, %36 : vector<16x128xf32>
      %cst_23 = arith.constant 0.000000e+00 : f32
      %40 = vector.broadcast %cst_23 : f32 to vector<16x128xf32>
      %41 = arith.select %38, %39, %40 : vector<16x128xi1>, vector<16x128xf32>
      %c0_24 = arith.constant 0 : index
      %c0_25 = arith.constant 0 : index
      %42 = vector.load %arg5[%c0_24, %c0_25] : memref<1x128xf32, #tpu.memory_space<vmem>>, vector<1x128xf32>
      %43 = vector.broadcast %42 : vector<1x128xf32> to vector<16x128xf32>
      %44 = arith.addf %41, %43 : vector<16x128xf32>
      %c0_26 = arith.constant 0 : index
      %c0_27 = arith.constant 0 : index
      %45 = vector.load %arg6[%c0_26, %c0_27] : memref<16x256xf32, #tpu.memory_space<vmem>>, vector<16x128xf32>
      tpu.vector_store %arg6[%c0_26, %c0_27], %44 {strides = array<i32>} : memref<16x256xf32, #tpu.memory_space<vmem>>, vector<16x128xf32>,
    } else {
    }
    return
  }
  func.func @transform_0(%arg0: i32) -> (i32, i32) {
    %c0_i32 = arith.constant 0 : i32
    %c0_i32_0 = arith.constant 0 : i32
    return %arg0, %c0_i32 : i32, i32
  }
  func.func @transform_1(%arg0: i32) -> (i32, i32) {
    %c0_i32 = arith.constant 0 : i32
    %c0_i32_0 = arith.constant 0 : i32
    return %c0_i32, %arg0 : i32, i32
  }
  func.func @transform_2(%arg0: i32) -> (i32, i32) {
    %c0_i32 = arith.constant 0 : i32
    %c0_i32_0 = arith.constant 0 : i32
    %c0_i32_1 = arith.constant 0 : i32
    return %c0_i32, %c0_i32_0 : i32, i32
  }
  func.func @transform_3(%arg0: i32) -> (i32, i32) {
    %c0_i32 = arith.constant 0 : i32
    %c0_i32_0 = arith.constant 0 : i32
    %c0_i32_1 = arith.constant 0 : i32
    return %c0_i32, %c0_i32_0 : i32, i32
  }
  func.func @transform_4(%arg0: i32) -> (i32, i32) {
    %c0_i32 = arith.constant 0 : i32
    %c0_i32_0 = arith.constant 0 : i32
    %c0_i32_1 = arith.constant 0 : i32
    return %c0_i32, %c0_i32_0 : i32, i32
  }
  func.func @transform_5(%arg0: i32) -> (i32, i32) {
    %c0_i32 = arith.constant 0 : i32
    %c0_i32_0 = arith.constant 0 : i32
    %c0_i32_1 = arith.constant 0 : i32
    return %c0_i32, %c0_i32_0 : i32, i32
  }
}

</mosaic_0001>

<bundles_post_ra>
// kernel: tpu_custom_call.1
= control target key start
LH: loop header
LB: loop body
LE: loop exit
PB: predicated region body
PF: predicated region fallthrough
CT: control target
= control target key end

     0   :  { %10 = vsyncpa [#allocation4], 0  ;;  %s1536_s18 = smov 0   ;;  %s1538_s19 = smov 0   ;;  %s1782_s0 = inlined_call_operand.vmem [shape: bf16[384,32], index: 0, kind: input, shape index: {}]   ;;  %s1783_s1 = inlined_call_operand.vmem [shape: bf16[16,384], index: 1, kind: input, shape index: {}]   ;;  %s1784_s2 = inlined_call_operand.vmem [shape: bf16[32,384], index: 2, kind: input, shape index: {}]   ;;  %s1785_s3 = inlined_call_operand.vmem [shape: bf16[128,128], index: 3, kind: input, shape index: {}]   ;;  %s1786_s4 = inlined_call_operand.vmem [shape: f32[1,128], index: 4, kind: input, shape index: {}]   ;;  %s1787_s5 = inlined_call_operand.hbm [shape: f32[16,256], index: 5, kind: output, shape index: {}]  }
   0x1   :  { %s1540_s20 = smov 0  }
   0x2 LB: > { %s1549_s21 = sadd.s32 4294967295, %s1497_s20   ;;  %s1551_s22 = sadd.s32 1, %s1497_s20   ;;  %s1497_s20 = sphi %s1540_s20, %s1790_s20   ;;  %s1493_s19 = sphi %s1538_s19, %s1789_s19   ;;  %s1489_s18 = sphi %s1536_s18, %s1788_s18  }
   0x3   : > { %s46_s23 = ssub.s32 %s1497_s20, %s1551_s22  ;;  %s49_s24 = sadd.s32 1, %s1493_s19 }
   0x4   : > { %p47_p0 = scmp.eq.s32.totalorder %s46_s23, 0  ;;  %p56_p1 = scmp.ne.s32.totalorder %s1493_s19, %s1489_s18 }
   0x5   : > { %p57_p2 = scmp.eq.s32.totalorder %s1497_s20, 0  ;;  %p1171_p4 = scmp.ge.s32.totalorder %s1497_s20, 3 }
   0x6   : > { %s1558_s25 = scalar_select %p47_p0, %s1493_s19, %s49_s24  }
   0x7   : > { %p58_p3 = por %p57_p2, %p56_p1  ;;  %175 = sbr.rel (%p1171_p4) target bundleno = 21 (0x15), region = 28 }
   0xe   : > { %187 = sbr.rel (!%p58_p3) target bundleno = 21 (0x15), region = 36  ;;  %s189_s26 = sand.u32 (%p58_p3), 1, %s1493_s19  }
   0xf   : > { %s1173_s27 = sshll.u32 (%p58_p3), %s1497_s20, 2  ;;  %s1172_s28 = sshll.u32 (%p58_p3), %s189_s26, 3 }
  0x10   : > { %s193_s6 = scalar_lea.vmem (%p58_p3), %s1783_s1, %s1173_s27  ;;  %s191_s7 = scalar_lea.vmem (%p58_p3), [#allocation2], %s1172_s28 }
  0x11   : > { %v209_v0 = vld [vmem:[%s193_s6] sm:$0xf] (%p58_p3)  ;;  %v211_v1 = vld [vmem:[%s193_s6 + $0xc] sm:$0xf] (%p58_p3) }
  0x12   : > { %210 = vst [vmem:[%s191_s7] sm:$0xf] (%p58_p3), %v209_v0  ;;  %212 = vst [vmem:[%s191_s7 + $0x4] sm:$0xf] (%p58_p3), %v211_v1 }
  0x15 PF: > { %p1174_p5 = scmp.ge.s32.totalorder %s1497_s20, 1  ;;  %p238_p6 = scmp.lt.s32.totalorder %s1497_s20, 4 }
  0x17   : > { %p239_p7 = pnand %p1174_p5, %p238_p6 }
  0x18   : > { %s245_s8 = sand.u32 (!%p239_p7), 1, %s1489_s18   ;;  %s1176_s9 = sshll.u32 (!%p239_p7), %s1549_s21, 4 }
  0x19   : > { %242 = sbr.rel (%p239_p7) target bundleno = 1049 (0x419), region = 77  ;;  %s1566_s10 = sshll.u32 (!%p239_p7), %s245_s8, 3 }
  0x1a   : > { %p273_p8 = scmp.lt.s32.totalorder (!%p239_p7), %s1176_s9, 47  ;;  %s247_s15 = scalar_lea.vmem (!%p239_p7), [#allocation2], %s1566_s10 }
  0x1b   : > { %p1178_p9 = scmp.ne.s32.totalorder (!%p239_p7), %s1549_s21, 0 }
  0x20   : > { %s1792_s9 = smov (!%p273_p8, %s1176_s9), 47  ;;  %282 = sbr.rel (%p1178_p9) target bundleno = 39 (0x27), region = 85 }
  0x21   : > { %s1177_s11 = sshll.u32 %s1792_s9, 2  ;;  %v1499_v2 = vmov (!%p1178_p9), 0.0  }
  0x22   : > { %s1571_s14 = scalar_lea.vmem %s1782_s0, %s1177_s11  ;;  %283 = vst [vmem:[#allocation3] sm:$0xff] (!%p1178_p9), %v1499_v2  ;;  %284 = vst [vmem:[#allocation3 + $0x8] sm:$0xff] (!%p1178_p9), %v1499_v2 }
  0x23   : > { %285 = vst [vmem:[#allocation3 + $0x10] sm:$0xff] (!%p1178_p9), %v1499_v2  ;;  %286 = vst [vmem:[#allocation3 + $0x18] sm:$0xff] (!%p1178_p9), %v1499_v2 }
  0x27 PF: > { %v1376_v3 = vld [vmem:[%s1784_s2 + $0x4] ss:$12 sps:$4 sm:$0xff]   ;;  %v1378_v4 = vld [vmem:[%s1784_s2] ss:$12 sps:$4 sm:$0xff]   ;;  %v1500_v5 = vmov 0   ;;  %vm383_vm0 = vcmask 261120  }
  0x28   : > { %440 = vmatprep.mubr.bf16.mxu0 %v1500_v5  ;;  %408 = vmatprep.subr.bf16.mxu0 %v1376_v3  ;;  %v1379_v6 = vld [vmem:[%s1784_s2 + $0x8] ss:$12 sps:$4 sm:$0xff]   ;;  %v1382_v8 = vld [vmem:[%s1784_s2 + $0x18] ss:$12 sps:$4 sm:$0xff]   ;;  %v1383_v9 = vld [vmem:[%s1784_s2 + $0x20] ss:$12 sps:$4 sm:$0xff]  }
  0x29   : > { %409 = vmatpush1.bf16.msra.mxu0 %v1378_v4  ;;  %v1380_v7 = vld [vmem:[%s1784_s2 + $0x1c] ss:$12 sps:$4 sm:$0xff]   ;;  %1267 = vmatprep.subr.bf16.mxu1 %v1379_v6  ;;  %v1384_v10 = vld [vmem:[%s1571_s14] sm:$0xff]   ;;  %v1386_v12 = vld [vmem:[%s1571_s14 + $0x10] sm:$0xff]   ;;  %p1218_p10 = scmp.ne.s32.totalorder %s1549_s21, 2 }
  0x2a   : > { %410 = vmatprep.subr.bf16.mxu0 %v1380_v7  ;;  %1268 = vmatpush3.bf16.msra.mxu1 %v1379_v6  ;;  %v1385_v11 = vld [vmem:[%s1571_s14 + $0x8] sm:$0xff]   ;;  %v1387_v13 = vld [vmem:[%s1571_s14 + $0x18] sm:$0xff]   ;;  %v1388_v14 = vld [vmem:[%s1571_s14 + $0x20] sm:$0xff]  }
  0x2b   : > { %1269 = vmatprep.subr.bf16.mxu1 %v1383_v9  ;;  %1271 = vmatprep.mubr.msk.bf16.mxu1 %vm383_vm0, %v1384_v10  ;;  %v1389_v15 = vld [vmem:[%s1571_s14 + $0x28] sm:$0xff]   ;;  %v1390_v16 = vld [vmem:[%s1571_s14 + $0x30] sm:$0xff]   ;;  %v1391_v17 = vld [vmem:[%s1571_s14 + $0x38] sm:$0xff]  }
  0x2c   : > { %v1392_v18 = vld [vmem:[%s1785_s3] sm:$0xff]   ;;  %v1393_v19 = vld [vmem:[%s1785_s3 + $0x8] sm:$0xff]   ;;  %v1394_v20 = vld [vmem:[%s1785_s3 + $0x10] sm:$0xff]  }
  0x2d   : > { %411 = vmatpush1.bf16.msra.mxu0 %v1382_v8  ;;  %v1395_v21 = vld [vmem:[%s1785_s3 + $0x18] sm:$0xff]   ;;  %v1396_v22 = vld [vmem:[%s1785_s3 + $0x20] sm:$0xff]   ;;  %v1397_v23 = vld [vmem:[%s1785_s3 + $0x28] sm:$0xff]  }
  0x2e   : > { %1270 = vmatpush3.bf16.msra.mxu1 %v1383_v9  ;;  %v1398_v24 = vld [vmem:[%s1785_s3 + $0x30] sm:$0xff]   ;;  %v1399_v25 = vld [vmem:[%s1785_s3 + $0x38] sm:$0xff]  }
  0x2f   : > { %1287 = vmatprep.subr.bf16.mxu1 %v1392_v18 }
  0x30   : > { %1193 = vmatmul.mubr.msk.bf16.vlgmr.msra.gmra.mrb[0].mxu0 %vm383_vm0, %v1384_v10 }
  0x31   : > { %450 = vmatprep.mubr.bf16.mxu0 %v1500_v5  ;;  %1272 = vmatmul.mubr.msk.bf16.vlgmr.msra.gmra.mrb[0].mxu1 %vm383_vm0, %v1385_v11 }
  0x32   : > { %1275 = vmatprep.mubr.msk.bf16.mxu1 %vm383_vm0, %v1386_v12  ;;  %1288 = vmatpush3.bf16.msra.mxu1 %v1392_v18 }
  0x33   : > { %1289 = vmatprep.subr.bf16.mxu1 %v1393_v19 }
  0x36   : > { %1290 = vmatpush3.bf16.msra.mxu1 %v1393_v19 }
  0x37   : > { %1291 = vmatprep.subr.bf16.mxu1 %v1394_v20 }
  0x38   : > { %1194 = vmatmul.mubr.msk.bf16.gmra.mrb[4].mxu0 %vm383_vm0, %v1385_v11 }
  0x39   : > { %460 = vmatprep.mubr.bf16.mxu0 %v1500_v5  ;;  %1276 = vmatmul.mubr.msk.bf16.gmra.mrb[4].mxu1 %vm383_vm0, %v1387_v13 }
  0x3a   : > { %1279 = vmatprep.mubr.msk.bf16.mxu1 %vm383_vm0, %v1388_v14  ;;  %1292 = vmatpush3.bf16.msra.mxu1 %v1394_v20 }
  0x3b   : > { %1293 = vmatprep.subr.bf16.mxu1 %v1395_v21 }
  0x3e   : > { %1294 = vmatpush3.bf16.msra.mxu1 %v1395_v21 }
  0x3f   : > { %1295 = vmatprep.subr.bf16.mxu1 %v1396_v22 }
  0x40   : > { %1195 = vmatmul.mubr.msk.bf16.gmra.mrb[8].mxu0 %vm383_vm0, %v1386_v12 }
  0x41   : > { %470 = vmatprep.mubr.bf16.mxu0 %v1500_v5  ;;  %1280 = vmatmul.mubr.msk.bf16.gmra.mrb[8].mxu1 %vm383_vm0, %v1389_v15 }
  0x42   : > { %1283 = vmatprep.mubr.msk.bf16.mxu1 %vm383_vm0, %v1390_v16  ;;  %1296 = vmatpush3.bf16.msra.mxu1 %v1396_v22 }
  0x43   : > { %1297 = vmatprep.subr.bf16.mxu1 %v1397_v23 }
  0x46   : > { %1298 = vmatpush3.bf16.msra.mxu1 %v1397_v23 }
  0x47   : > { %1299 = vmatprep.subr.bf16.mxu1 %v1398_v24 }
  0x48   : > { %1196 = vmatmul.mubr.msk.bf16.gmra.mrb[12].mxu0 %vm383_vm0, %v1387_v13 }
  0x49   : > { %480 = vmatprep.mubr.bf16.mxu0 %v1500_v5  ;;  %1284 = vmatmul.mubr.msk.bf16.gmra.mrb[12].mxu1 %vm383_vm0, %v1391_v17 }
  0x4a   : > { %1300 = vmatpush3.bf16.msra.mxu1 %v1398_v24 }
  0x4b   : > { %1301 = vmatprep.subr.bf16.mxu1 %v1399_v25 }
  0x4e   : > { %1302 = vmatpush3.bf16.msra.mxu1 %v1399_v25 }
  0x50   : > { %1197 = vmatmul.mubr.msk.bf16.gmra.mrb[16].mxu0 %vm383_vm0, %v1388_v14 }
  0x51   : > { %490 = vmatprep.mubr.bf16.mxu0 %v1500_v5 }
  0x58   : > { %1198 = vmatmul.mubr.msk.bf16.gmra.mrb[20].mxu0 %vm383_vm0, %v1389_v15 }
  0x59   : > { %500 = vmatprep.mubr.bf16.mxu0 %v1500_v5 }
  0x60   : > { %1199 = vmatmul.mubr.msk.bf16.gmra.mrb[24].mxu0 %vm383_vm0, %v1390_v16 }
  0x61   : > { %510 = vmatprep.mubr.bf16.mxu0 %v1500_v5 }
  0x68   : > { %1200 = vmatmul.mubr.msk.bf16.gmra.mrb[28].mxu0 %vm383_vm0, %v1391_v17 }
  0x69   : > { %951 = vmatprep.mubr.bf16.mxu0 %v1500_v5 }
 0x103   : > { %v1641_v26 = vpop.f32.mrb[0].mxu0 }
 0x104   : > { %v444_v27 = vpop.f32.mrb[1].mxu0  ;;  %v1273_v30 = vpop.f32.mrb[0].mxu1 }
 0x105   : > { %vm618_vm1 = vcmp.gt.f32.partialorder %v444_v27, 0.0  ;;  %v634_v28 = vmul.f32 0.2, %v444_v27  ;;  %v1643_v29 = vpop.f32.mrb[2].mxu0  ;;  %v555_v32 = vpop.f32.mrb[1].mxu1 }
 0x106   : > { %v448_v31 = vpop.f32.mrb[3].mxu0  ;;  %v1274_v35 = vpop.f32.mrb[2].mxu1 }
 0x107   : > { %vm619_vm2 = vcmp.gt.f32.partialorder %v448_v31, 0.0  ;;  %v635_v33 = vmul.f32 0.2, %v448_v31  ;;  %v650_v34 = vsel %vm618_vm1, %v444_v27, %v634_v28  ;;  %v558_v37 = vpop.f32.mrb[3].mxu1  ;;  %vm1502_vm1 = vmmov (!%p1218_p10), 0  }
 0x108   : > { %v666_v36 = vsub.f32 %v650_v34, %v555_v32 }
 0x109   : > { %v651_v38 = vsel %vm619_vm2, %v448_v31, %v635_v33 }
 0x10a   : > { %v682_v39 = vmul.f32 1.442695, %v666_v36  ;;  %v667_v40 = vsub.f32 %v651_v38, %v558_v37 }
 0x10b   : > { %v1645_v41 = vpop.f32.mrb[4].mxu0 }
 0x10c   : > { %v684_v42 = vmul.f32 1.442695, %v667_v40  ;;  %v454_v43 = vpop.f32.mrb[5].mxu0  ;;  %1401 = vpow2.f32 %v682_v39  ;;  %v1277_v46 = vpop.f32.mrb[4].mxu1 }
 0x10d   : > { %vm620_vm3 = vcmp.gt.f32.partialorder %v454_v43, 0.0  ;;  %v636_v44 = vmul.f32 0.2, %v454_v43  ;;  %v1647_v45 = vpop.f32.mrb[6].mxu0  ;;  %v571_v48 = vpop.f32.mrb[5].mxu1 }
 0x10e   : > { %1403 = vpow2.f32 %v684_v42  ;;  %v458_v47 = vpop.f32.mrb[7].mxu0  ;;  %v1278_v51 = vpop.f32.mrb[6].mxu1 }
 0x10f   : > { %v652_v49 = vsel %vm620_vm3, %v454_v43, %v636_v44  ;;  %vm621_vm4 = vcmp.gt.f32.partialorder %v458_v47, 0.0  ;;  %v637_v50 = vmul.f32 0.2, %v458_v47  ;;  %v574_v53 = vpop.f32.mrb[7].mxu1 }
 0x110   : > { %v668_v52 = vsub.f32 %v652_v49, %v1273_v30 }
 0x111   : > { %v653_v54 = vsel %vm621_vm4, %v458_v47, %v637_v50 }
 0x112   : > { %v686_v55 = vmul.f32 1.442695, %v668_v52  ;;  %v669_v56 = vsub.f32 %v653_v54, %v1274_v35 }
 0x113   : > { %v1649_v57 = vpop.f32.mrb[8].mxu0 }
 0x114   : > { %v688_v58 = vmul.f32 1.442695, %v669_v56  ;;  %v464_v59 = vpop.f32.mrb[9].mxu0  ;;  %1405 = vpow2.f32 %v686_v55  ;;  %v1653_v62 = vpop.f32.mrb[8].mxu1 }
 0x115   : > { %vm622_vm5 = vcmp.gt.f32.partialorder %v464_v59, 0.0  ;;  %v638_v60 = vmul.f32 0.2, %v464_v59  ;;  %v1651_v61 = vpop.f32.mrb[10].mxu0  ;;  %v587_v0 = vpop.f32.mrb[9].mxu1 }
 0x116   : > { %1407 = vpow2.f32 %v688_v58  ;;  %v468_v63 = vpop.f32.mrb[11].mxu0  ;;  %v1402_v1 = vpop.eup %1401 }
 0x117   : > { %vm623_vm6 = vcmp.gt.f32.partialorder %v468_v63, 0.0  ;;  %v639_v2 = vmul.f32 0.2, %v468_v63  ;;  %v654_v3 = vsel %vm622_vm5, %v464_v59, %v638_v60  ;;  %v1655_v4 = vpop.f32.mrb[10].mxu1 }
 0x118   : > { %v1404_v5 = vpop.eup %1403  ;;  %v670_v6 = vsub.f32 %v654_v3, %v571_v48  ;;  %v590_v7 = vpop.f32.mrb[11].mxu1 }
 0x119   : > { %v655_v8 = vsel %vm623_vm6, %v468_v63, %v639_v2  ;;  %v714_v9 = vpack.c.bf16 %v1404_v5, %v1402_v1 }
 0x11a   : > { %v690_v10 = vmul.f32 1.442695, %v670_v6  ;;  %v671_v11 = vsub.f32 %v655_v8, %v574_v53 }
 0x11b   : > { %v1657_v12 = vpop.f32.mrb[12].mxu0  ;;  %1303 = vmatprep.mubr.bf16.mxu1 %v714_v9  ;;  %919 = vmatprep.subr.bf16.mxu0 %v714_v9 }
 0x11c   : > { %v692_v13 = vmul.f32 1.442695, %v671_v11  ;;  %v474_v14 = vpop.f32.mrb[13].mxu0  ;;  %1409 = vpow2.f32 %v690_v10  ;;  %v1661_v17 = vpop.f32.mrb[12].mxu1 }
 0x11d   : > { %vm624_vm7 = vcmp.gt.f32.partialorder %v474_v14, 0.0  ;;  %v640_v15 = vmul.f32 0.2, %v474_v14  ;;  %v1659_v16 = vpop.f32.mrb[14].mxu0  ;;  %v1663_v19 = vpop.f32.mrb[13].mxu1 }
 0x11e   : > { %1411 = vpow2.f32 %v692_v13  ;;  %v478_v18 = vpop.f32.mrb[15].mxu0  ;;  %v1406_v20 = vpop.eup %1405 }
 0x11f   : > { %v656_v21 = vsel %vm624_vm7, %v474_v14, %v640_v15  ;;  %vm625_vm8 = vcmp.gt.f32.partialorder %v478_v18, 0.0  ;;  %v641_v22 = vmul.f32 0.2, %v478_v18  ;;  %v1665_v23 = vpop.f32.mrb[14].mxu1 }
 0x120   : > { %v1408_v24 = vpop.eup %1407  ;;  %v672_v25 = vsub.f32 %v656_v21, %v1277_v46  ;;  %v1667_v27 = vpop.f32.mrb[15].mxu1 }
 0x121   : > { %v657_v28 = vsel %vm625_vm8, %v478_v18, %v641_v22  ;;  %v1669_v30 = vpack.c.bf16 %v1408_v24, %v1406_v20 }
 0x122   : > { %v694_v31 = vmul.f32 1.442695, %v672_v25  ;;  %v673_v32 = vsub.f32 %v657_v28, %v1278_v51 }
 0x123   : > { %v1671_v33 = vpop.f32.mrb[16].mxu0  ;;  %1304 = vmatmul.mubr.bf16.vlgmr.msra.gmra.mrb[16].mxu1 %v1669_v30 }
 0x124   : > { %v696_v34 = vmul.f32 1.442695, %v673_v32  ;;  %v484_v35 = vpop.f32.mrb[17].mxu0  ;;  %1413 = vpow2.f32 %v694_v31 }
 0x125   : > { %vm626_vm9 = vcmp.gt.f32.partialorder %v484_v35, 0.0  ;;  %v642_v36 = vmul.f32 0.2, %v484_v35  ;;  %v1674_v37 = vpop.f32.mrb[18].mxu0 }
 0x126   : > { %1415 = vpow2.f32 %v696_v34  ;;  %v488_v38 = vpop.f32.mrb[19].mxu0  ;;  %v1410_v39 = vpop.eup %1409 }
 0x127   : > { %vm627_vm10 = vcmp.gt.f32.partialorder %v488_v38, 0.0  ;;  %v643_v40 = vmul.f32 0.2, %v488_v38  ;;  %v658_v42 = vsel %vm626_vm9, %v484_v35, %v642_v36 }
 0x128   : > { %v1412_v43 = vpop.eup %1411  ;;  %v674_v44 = vsub.f32 %v658_v42, %v587_v0 }
 0x129   : > { %v659_v46 = vsel %vm627_vm10, %v488_v38, %v643_v40  ;;  %v1676_v47 = vpack.c.bf16 %v1412_v43, %v1410_v39 }
 0x12a   : > { %v698_v48 = vmul.f32 1.442695, %v674_v44  ;;  %v675_v49 = vsub.f32 %v659_v46, %v590_v7 }
 0x12b   : > { %v1678_v50 = vpop.f32.mrb[20].mxu0  ;;  %1307 = vmatprep.mubr.bf16.mxu1 %v1676_v47 }
 0x12c   : > { %v700_v51 = vmul.f32 1.442695, %v675_v49  ;;  %v494_v52 = vpop.f32.mrb[21].mxu0  ;;  %1417 = vpow2.f32 %v698_v48 }
 0x12d   : > { %vm628_vm11 = vcmp.gt.f32.partialorder %v494_v52, 0.0  ;;  %v644_v53 = vmul.f32 0.2, %v494_v52  ;;  %v1681_v54 = vpop.f32.mrb[22].mxu0 }
 0x12e   : > { %1419 = vpow2.f32 %v700_v51  ;;  %v498_v55 = vpop.f32.mrb[23].mxu0  ;;  %v1414_v56 = vpop.eup %1413 }
 0x12f   : > { %v660_v58 = vsel %vm628_vm11, %v494_v52, %v644_v53  ;;  %vm629_vm12 = vcmp.gt.f32.partialorder %v498_v55, 0.0  ;;  %v645_v59 = vmul.f32 0.2, %v498_v55 }
 0x130   : > { %v1416_v60 = vpop.eup %1415  ;;  %v676_v63 = vsub.f32 %v660_v58, %v1653_v62 }
 0x131   : > { %v661_v0 = vsel %vm629_vm12, %v498_v55, %v645_v59  ;;  %v1684_v1 = vpack.c.bf16 %v1416_v60, %v1414_v56 }
 0x132   : > { %v702_v2 = vmul.f32 1.442695, %v676_v63  ;;  %v677_v3 = vsub.f32 %v661_v0, %v1655_v4 }
 0x133   : > { %v1687_v5 = vpop.f32.mrb[24].mxu0  ;;  %1308 = vmatmul.mubr.bf16.gmra.mrb[20].mxu1 %v1684_v1 }
 0x134   : > { %v704_v6 = vmul.f32 1.442695, %v677_v3  ;;  %v504_v7 = vpop.f32.mrb[25].mxu0  ;;  %1421 = vpow2.f32 %v702_v2 }
 0x135   : > { %vm630_vm13 = vcmp.gt.f32.partialorder %v504_v7, 0.0  ;;  %v646_v8 = vmul.f32 0.2, %v504_v7  ;;  %v1690_v9 = vpop.f32.mrb[26].mxu0 }
 0x136   : > { %1423 = vpow2.f32 %v704_v6  ;;  %v508_v10 = vpop.f32.mrb[27].mxu0  ;;  %v1418_v62 = vpop.eup %1417 }
 0x137   : > { %vm631_vm14 = vcmp.gt.f32.partialorder %v508_v10, 0.0  ;;  %v647_v11 = vmul.f32 0.2, %v508_v10  ;;  %v662_v13 = vsel %vm630_vm13, %v504_v7, %v646_v8 }
 0x138   : > { %v1420_v14 = vpop.eup %1419  ;;  %v678_v4 = vsub.f32 %v662_v13, %v1663_v19 }
 0x139   : > { %v663_v15 = vsel %vm631_vm14, %v508_v10, %v647_v11  ;;  %v718_v18 = vpack.c.bf16 %v1420_v14, %v1418_v62 }
 0x13a   : > { %v706_v20 = vmul.f32 1.442695, %v678_v4  ;;  %v679_v21 = vsub.f32 %v663_v15, %v1667_v27 }
 0x13b   : > { %v1694_v22 = vpop.f32.mrb[28].mxu0  ;;  %1311 = vmatprep.mubr.bf16.mxu1 %v718_v18 }
 0x13c   : > { %v708_v24 = vmul.f32 1.442695, %v679_v21  ;;  %v514_v25 = vpop.f32.mrb[29].mxu0  ;;  %1425 = vpow2.f32 %v706_v20 }
 0x13d   : > { %vm632_vm15 = vcmp.gt.f32.partialorder %v514_v25, 0.0  ;;  %v648_v28 = vmul.f32 0.2, %v514_v25  ;;  %v1696_v31 = vpop.f32.mrb[30].mxu0 }
 0x13e   : > { %1427 = vpow2.f32 %v708_v24  ;;  %v518_v32 = vpop.f32.mrb[31].mxu0  ;;  %v1422_v34 = vpop.eup %1421  ;;  %v1400_v24 = vld [vmem:[%s247_s15] sm:$0xff]  }
 0x13f   : > { %v664_v35 = vsel %vm632_vm15, %v514_v25, %v648_v28  ;;  %vm633_vm0 = vcmp.gt.f32.partialorder %v518_v32, 0.0  ;;  %v649_v19 = vmul.f32 0.2, %v518_v32  ;;  %v907_v25 = vld [vmem:[#allocation3] sm:$0xff]  ;;  %v908_v28 = vld [vmem:[#allocation3 + $0x8] sm:$0xff] }
 0x140   : > { %v1424_v36 = vpop.eup %1423  ;;  %v680_v38 = vsub.f32 %v664_v35, %v1661_v17  ;;  %v910_v35 = vld [vmem:[#allocation3 + $0x18] sm:$0xff] }
 0x141   : > { %v665_v27 = vsel %vm633_vm0, %v518_v32, %v649_v19  ;;  %v719_v39 = vpack.c.bf16 %v1424_v36, %v1422_v34  ;;  %v909_v32 = vld [vmem:[#allocation3 + $0x10] sm:$0xff] }
 0x142   : > { %v710_v40 = vmul.f32 1.442695, %v680_v38  ;;  %v681_v42 = vsub.f32 %v665_v27, %v1665_v23  ;;  %v1433_v27 = vld [vmem:[%s1785_s3] sm:$0xff] (!%p1218_p10)  }
 0x143   : > { %1312 = vmatmul.mubr.bf16.gmra.mrb[24].mxu1 %v719_v39 }
 0x144   : > { %v712_v43 = vmul.f32 1.442695, %v681_v42  ;;  %1429 = vpow2.f32 %v710_v40  ;;  %v1434_v40 = vld [vmem:[%s1785_s3 + $0x8] sm:$0xff] (!%p1218_p10)   ;;  %v1435_v42 = vld [vmem:[%s1785_s3 + $0x10] sm:$0xff] (!%p1218_p10)  }
 0x146   : > { %1431 = vpow2.f32 %v712_v43  ;;  %v1426_v44 = vpop.eup %1425  ;;  %v1436_v43 = vld [vmem:[%s1785_s3 + $0x18] sm:$0xff] (!%p1218_p10)  }
 0x148   : > { %v1428_v46 = vpop.eup %1427 }
 0x149   : > { %v720_v48 = vpack.c.bf16 %v1428_v46, %v1426_v44  ;;  %v1437_v44 = vld [vmem:[%s1785_s3 + $0x20] sm:$0xff] (!%p1218_p10)   ;;  %v1438_v46 = vld [vmem:[%s1785_s3 + $0x28] sm:$0xff] (!%p1218_p10)  }
 0x14b   : > { %1315 = vmatprep.mubr.bf16.mxu1 %v720_v48 }
 0x14e   : > { %v1430_v49 = vpop.eup %1429 }
 0x150   : > { %v1432_v51 = vpop.eup %1431 }
 0x151   : > { %v721_v52 = vpack.c.bf16 %v1432_v51, %v1430_v49  ;;  %v1440_v49 = vld [vmem:[%s1785_s3 + $0x38] sm:$0xff] (!%p1218_p10)  }
 0x153   : > { %1316 = vmatmul.mubr.bf16.gmra.mrb[28].mxu1 %v721_v52 }
 0x1f6   : > { %v1305_v53 = vpop.f32.mrb[16].mxu1 }
 0x1f7   : > { %v885_v17 = vmul.f32 %v1305_v53, %v1645_v41  ;;  %v820_v55 = vpop.f32.mrb[17].mxu1 }
 0x1f8   : > { %v883_v56 = vmul.f32 %v820_v55, %v1641_v26  ;;  %v1306_v58 = vpop.f32.mrb[18].mxu1 }
 0x1f9   : > { %v886_v23 = vmul.f32 %v1306_v58, %v1647_v45  ;;  %v823_v59 = vpop.f32.mrb[19].mxu1 }
 0x1fa   : > { %v884_v60 = vmul.f32 %v823_v59, %v1643_v29 }
 0x1fb   : > { %v900_v63 = vpack.c.bf16 %v886_v23, %v885_v17 }
 0x1fc   : > { %v899_v0 = vpack.c.bf16 %v884_v60, %v883_v56 }
 0x1fe   : > { %920 = vmatpush1.bf16.msra.mxu0 %v899_v0  ;;  %v1227_v0 = vld [vmem:[%s1786_s4] ss:$0 sm:$0xff] (!%p1218_p10) }
 0x1ff   : > { %921 = vmatprep.subr.bf16.mxu0 %v1669_v30 }
 0x202   : > { %922 = vmatpush1.bf16.msra.mxu0 %v900_v63 }
 0x203   : > { %923 = vmatprep.subr.bf16.mxu0 %v1676_v47 }
 0x206   : > { %v1309_v2 = vpop.f32.mrb[20].mxu1 }
 0x207   : > { %v889_v41 = vmul.f32 %v1309_v2, %v1657_v12  ;;  %v836_v3 = vpop.f32.mrb[21].mxu1 }
 0x208   : > { %v887_v26 = vmul.f32 %v836_v3, %v1649_v57  ;;  %v1310_v6 = vpop.f32.mrb[22].mxu1 }
 0x209   : > { %v890_v45 = vmul.f32 %v1310_v6, %v1659_v16  ;;  %v839_v7 = vpop.f32.mrb[23].mxu1 }
 0x20a   : > { %v888_v29 = vmul.f32 %v839_v7, %v1651_v61 }
 0x20b   : > { %v902_v8 = vpack.c.bf16 %v890_v45, %v889_v41 }
 0x20c   : > { %v901_v10 = vpack.c.bf16 %v888_v29, %v887_v26 }
 0x20e   : > { %924 = vmatpush1.bf16.msra.mxu0 %v901_v10 }
 0x20f   : > { %925 = vmatprep.subr.bf16.mxu0 %v1684_v1 }
 0x212   : > { %926 = vmatpush1.bf16.msra.mxu0 %v902_v8 }
 0x213   : > { %927 = vmatprep.subr.bf16.mxu0 %v718_v18 }
 0x216   : > { %v1313_v30 = vpop.f32.mrb[24].mxu1 }
 0x217   : > { %v893_v47 = vmul.f32 %v1313_v30, %v1678_v50  ;;  %v852_v12 = vpop.f32.mrb[25].mxu1 }
 0x218   : > { %v891_v62 = vmul.f32 %v852_v12, %v1671_v33  ;;  %v1314_v57 = vpop.f32.mrb[26].mxu1 }
 0x219   : > { %v894_v11 = vmul.f32 %v1314_v57, %v1681_v54  ;;  %v855_v16 = vpop.f32.mrb[27].mxu1 }
 0x21a   : > { %v892_v13 = vmul.f32 %v855_v16, %v1674_v37 }
 0x21b   : > { %v904_v61 = vpack.c.bf16 %v894_v11, %v893_v47 }
 0x21c   : > { %v903_v14 = vpack.c.bf16 %v892_v13, %v891_v62 }
 0x21e   : > { %928 = vmatpush1.bf16.msra.mxu0 %v903_v14 }
 0x21f   : > { %929 = vmatprep.subr.bf16.mxu0 %v719_v39  ;;  %v1501_v39 = vmov (!%p1218_p10), 0.0  }
 0x222   : > { %930 = vmatpush1.bf16.msra.mxu0 %v904_v61 }
 0x223   : > { %931 = vmatprep.subr.bf16.mxu0 %v720_v48  ;;  %v1439_v48 = vld [vmem:[%s1785_s3 + $0x30] sm:$0xff] (!%p1218_p10)  }
 0x226   : > { %v1317_v1 = vpop.f32.mrb[28].mxu1 }
 0x227   : > { %v897_v4 = vmul.f32 %v1317_v1, %v1694_v22  ;;  %v868_v50 = vpop.f32.mrb[29].mxu1 }
 0x228   : > { %v895_v15 = vmul.f32 %v868_v50, %v1687_v5  ;;  %v1318_v33 = vpop.f32.mrb[30].mxu1 }
 0x229   : > { %v898_v18 = vmul.f32 %v1318_v33, %v1696_v31  ;;  %v871_v54 = vpop.f32.mrb[31].mxu1 }
 0x22a   : > { %v896_v20 = vmul.f32 %v871_v54, %v1690_v9 }
 0x22b   : > { %v906_v37 = vpack.c.bf16 %v898_v18, %v897_v4 }
 0x22c   : > { %v905_v21 = vpack.c.bf16 %v896_v20, %v895_v15 }
 0x22e   : > { %932 = vmatpush1.bf16.msra.mxu0 %v905_v21 }
 0x22f   : > { %933 = vmatprep.subr.bf16.mxu0 %v721_v52 }
 0x232   : > { %934 = vmatpush1.bf16.msra.mxu0 %v906_v37 }
 0x233   : > { %1319 = vmatprep.subr.bf16.mxu0 (!%p1218_p10), %v1501_v39 }
 0x235   : > { %952 = vmatmul.mubr.bf16.vlgmr.msra.gmra.mrb[32].mxu0 %v1400_v24 }
 0x236   : > { %1320 = vmatpush3.bf16.msra.mxu0 (!%p1218_p10), %v1433_v27  ;;  %1335 = vmatprep.mubr.msk.bf16.mxu0 (!%p1218_p10), %vm1502_vm1, %v1501_v39 }
 0x237   : > { %1321 = vmatprep.subr.bf16.mxu0 (!%p1218_p10), %v1501_v39 }
 0x23a   : > { %1322 = vmatpush3.bf16.msra.mxu0 (!%p1218_p10), %v1434_v40 }
 0x23b   : > { %1323 = vmatprep.subr.bf16.mxu0 (!%p1218_p10), %v1501_v39 }
 0x23e   : > { %1324 = vmatpush3.bf16.msra.mxu0 (!%p1218_p10), %v1435_v42 }
 0x23f   : > { %1325 = vmatprep.subr.bf16.mxu0 (!%p1218_p10), %v1501_v39 }
 0x242   : > { %1326 = vmatpush3.bf16.msra.mxu0 (!%p1218_p10), %v1436_v43 }
 0x243   : > { %1327 = vmatprep.subr.bf16.mxu0 (!%p1218_p10), %v1501_v39 }
 0x246   : > { %1328 = vmatpush3.bf16.msra.mxu0 (!%p1218_p10), %v1437_v44 }
 0x247   : > { %1329 = vmatprep.subr.bf16.mxu0 (!%p1218_p10), %v1501_v39 }
 0x24a   : > { %1330 = vmatpush3.bf16.msra.mxu0 (!%p1218_p10), %v1438_v46 }
 0x24b   : > { %1331 = vmatprep.subr.bf16.mxu0 (!%p1218_p10), %v1501_v39 }
 0x24e   : > { %1332 = vmatpush3.bf16.msra.mxu0 (!%p1218_p10), %v1439_v48 }
 0x24f   : > { %1333 = vmatprep.subr.bf16.mxu0 (!%p1218_p10), %v1501_v39 }
 0x252   : > { %1334 = vmatpush3.bf16.msra.mxu0 (!%p1218_p10), %v1440_v49 }
 0x308   : > { %v953_v22 = vpop.f32.mrb[32].mxu0  ;;  %973 = sbr.rel (%p1218_p10) target bundleno = 1023 (0x3ff), region = 89 }
 0x309   : > { %v962_v34 = vadd.f32 %v953_v22, %v907_v25  ;;  %v955_v5 = vpop.f32.mrb[33].mxu0 }
 0x30a   : > { %v963_v19 = vadd.f32 %v955_v5, %v908_v28  ;;  %v957_v31 = vpop.f32.mrb[34].mxu0 }
 0x30b   : > { %966 = vst [vmem:[#allocation3] sm:$0xff] %v962_v34  ;;  %v964_v36 = vadd.f32 %v957_v31, %v909_v32  ;;  %v959_v9 = vpop.f32.mrb[35].mxu0 }
 0x30c   : > { %967 = vst [vmem:[#allocation3 + $0x8] sm:$0xff] %v963_v19  ;;  %v965_v38 = vadd.f32 %v959_v9, %v910_v35 }
 0x30d   : > { %968 = vst [vmem:[#allocation3 + $0x10] sm:$0xff] %v964_v36 }
 0x30e   : > { %969 = vst [vmem:[#allocation3 + $0x18] sm:$0xff] %v965_v38 }
 0x312   : > { %v974_v23 = vld [vmem:[#allocation3] sm:$0xff] }
 0x313   : > { %v975_v51 = vld [vmem:[#allocation3 + $0x8] sm:$0xff] }
 0x314   : > { %v976_v60 = vld [vmem:[#allocation3 + $0x10] sm:$0xff] }
 0x315   : > { %v977_v52 = vld [vmem:[#allocation3 + $0x18] sm:$0xff] }
 0x316   : > { %v978_v53 = vpack.c.bf16 %v977_v52, %v975_v51 }
 0x318   : > { %1336 = vmatmul.mubr.bf16.vlgmr.msra.gmra.mrb[0].mxu0 %v978_v53 }
 0x3eb   : > { %v1077_v17 = vpop.f32.mrb[0].mxu0 }
 0x3ec   : > { %1441 = vrcp.f32 %v1077_v17  ;;  %v1337_v55 = vpop.f32.mrb[1].mxu0  ;;  %vm1086_vm2 = vcmp.gt.f32.partialorder %v1077_v17, 0.0 }
 0x3ed   : > { %v1080_v56 = vpop.f32.mrb[2].mxu0 }
 0x3ee   : > { %1443 = vrcp.f32 %v1080_v56  ;;  %v1338_v58 = vpop.f32.mrb[3].mxu0  ;;  %vm1087_vm3 = vcmp.gt.f32.partialorder %v1080_v56, 0.0 }
 0x3f6   : > { %v1442_v59 = vpop.eup %1441 }
 0x3f7   : > { %v1088_v63 = vmul.f32 %v1442_v59, %v974_v23 }
 0x3f8   : > { %v1444_v2 = vpop.eup %1443 }
 0x3f9   : > { %v1090_v41 = vsel %vm1086_vm2, %v1088_v63, 0.0  ;;  %v1089_v3 = vmul.f32 %v1444_v2, %v976_v60 }
 0x3fa   : > { %v1099_v26 = vadd.f32 %v1227_v0, %v1090_v41 }
 0x3fb   : > { %v1091_v6 = vsel %vm1087_vm3, %v1089_v3, 0.0 }
 0x3fc   : > { %1101 = vst [vmem:[#allocation3] sm:$0xff] %v1099_v26  ;;  %v1100_v45 = vadd.f32 %v1227_v0, %v1091_v6 }
 0x3fe   : > { %1102 = vst [vmem:[#allocation3 + $0x10] sm:$0xff] %v1100_v45 }
 0x3ff PF: > { %p1343_p11 = scmp.eq.s32.totalorder %s1549_s21, 2  ;;  %s1503_s26 = smov [#allocation3]  }
 0x400   : > { %s1109_s27 = sshll.u32 %s1503_s26, 4  ;;  %s1110_s27 = int_to_ptr.vmem [resolvable:$true] %s1109_s27 }
 0x401   : > { %s1445_s28 = scalar_lea.vmem %s1110_s27, 512  ;;  %p1452_p1 = scmp.lt.s32.totalorder %s1110_s27, %s1110_s27 }
 0x402   : > { %p1446_p12 = scmp.ne.s32.totalorder %s1110_s27, %s1445_s28  ;;  %p1453_p2 = scmp.lt.s32.totalorder %s1445_s28, %s1445_s28 }
 0x404   : > { %p1447_p13 = pnand %p1446_p12, %p1343_p11  ;;  %p1454_p3 = por %p1453_p2, %p1452_p1 }
 0x406   : > { %p1448_p0 = pneg %p1447_p13 }
 0x408   : > { %p1455_p4 = pnand %p1454_p3, %p1448_p0 }
 0x40a   : > { %1458 = shalt.err (!%p1455_p4)
}
 0x40b   : > { %s1459_s29 = scalar_lea.hbm %s1787_s5, 512 }
 0x40c   : > { %p1460_p5 = scmp.ne.s32.totalorder %s1787_s5, %s1459_s29  ;;  %p1465_p8 = scmp.lt.u32.totalorder %s1459_s29, %s1787_s5 }
 0x40e   : > { %p1461_p6 = pnand %p1460_p5, %p1343_p11 }
 0x410   : > { %p1462_p7 = pneg %p1461_p6 }
 0x412   : > { %p1467_p9 = pnand %p1465_p8, %p1462_p7 }
 0x414   : > { %1470 = shalt.err (!%p1467_p9)
}
 0x415   : > { %s1504_s9 = smov 256   ;;  %s1505_s11 = smov 16  }
 0x416   : > { %1340 = dma.vmem_to_hbm [thread:$0]  (%p1343_p11), %s1110_s27, 512, %s1787_s5, [#allocation4], %s1504_s9, %s1504_s9, %s1505_s11  }
 0x417   : > { %1484 = dma.done.wait (%p1343_p11), [#allocation4], 512  }
 0x418   : > { %1486 = vsyncadd (%p1343_p11), [#allocation4], 4294966784 }
 0x419 PF: > { %p13_p10 = scmp.ge.s32.totalorder %s1551_s22, 5   ;;  %s1788_s18 = smov %s1493_s19 }
 0x41a   : > { %s1789_s19 = smov %s1558_s25  ;;  %s1790_s20 = smov %s1551_s22 }
 0x41b   :  { %15 = sbr.rel (!%p13_p10) target bundleno = 2 (0x2), region = 124 }
 0x422   :  { %1125 = vsyncpa [#allocation4], 1 }
 0x423   :  { %1127 = vsyncpa [#allocation4 + $0x1], 1 }

</bundles_post_ra>
